<compile_context>
chip_gen: v7x
topology: tpu7x:2x2x1
jax: 0.10.0
libtpu: 0.0.40
codegen_flags: <defaults>
</compile_context>

<pallas_src>
import numpy as np
import jax
import jax.numpy as jnp
from jax import lax
from jax.experimental import pallas as pl
from jax.experimental.pallas import tpu as pltpu

EDGE_Z = 1  # module-level constant in mousenet

# bfloat16 operands give ~2-8x MXU rate and halve weight/patch traffic on every
# generation (largest relative win on v5e); kept at float32 here so the
# numerical check against the float32 XLA reference stays tight at these tiny
# shapes.  Switching is a one-constant change: weights/masks are pre-cast at
# pack time and patches are cast in-kernel; keep gate elementwise math in f32.
MATMUL_DTYPE = jnp.float32


def _sublane(dtype):
    # sublane packing multiple for the matmul operand dtype
    return 16 if dtype == jnp.bfloat16 else 8


# ----------------------------------------------------------------------------
# Gaussian mask generation (numpy, deterministic) — mirrors Conv2dMask helpers
# ----------------------------------------------------------------------------
def make_gaussian_kernel_mask(peak, sigma, rng):
    width = int(sigma * EDGE_Z)
    x = np.arange(-width, width + 1)
    X, Y = np.meshgrid(x, x)
    radius = np.sqrt(X ** 2 + Y ** 2)
    probability = peak * np.exp(-radius ** 2 / 2 / sigma ** 2)
    return rng.random((len(x), len(x))) < probability


def make_gaussian_kernel_mask_vary_channel(peak, sigma, kernel_size,
                                           out_channels, in_channels, rng):
    re = np.zeros((out_channels, in_channels, kernel_size, kernel_size))
    for i in range(out_channels):
        for j in range(in_channels):
            re[i, j, :] = make_gaussian_kernel_mask(peak, sigma, rng)
    return re


# ----------------------------------------------------------------------------
# One-time probe: pin the rotation direction of pltpu.roll
# ----------------------------------------------------------------------------
_ROLL_TO_HIGHER = None


def _roll_convention():
    """The kernel only uses roll via `shifted(v, d)[:, n] == v[:, (n+d) % N]`;
    this tiny on-device probe makes that identity hold under either rotation
    convention of the underlying hardware primitive."""
    global _ROLL_TO_HIGHER
    if _ROLL_TO_HIGHER is None:
        def probe(x_ref, o_ref):
            o_ref[...] = pltpu.roll(x_ref[...], 1, 1)

        xs = jnp.tile(jnp.arange(128, dtype=jnp.float32)[None, :], (8, 1))
        out = pl.pallas_call(
            probe, out_shape=jax.ShapeDtypeStruct((8, 128), jnp.float32))(xs)
        first = int(np.asarray(out)[0, 0])
        if first == 127:        # jnp.roll convention (elements move upward)
            _ROLL_TO_HIGHER = True
        elif first == 1:        # opposite convention
            _ROLL_TO_HIGHER = False
        else:
            raise RuntimeError(f"unexpected pltpu.roll result: {first}")
    return _ROLL_TO_HIGHER


# ----------------------------------------------------------------------------
# Precomputed per-tap validity masks for the 'same'-padded conv
# ----------------------------------------------------------------------------
def make_shift_masks(num_images, H, W, k):
    """[k*k, num_images*H*W]: 1.0 where the (dy, dx) tap lands inside an image.
    Lane order is image-major / row-major, so the mask pattern repeats every
    H*W lanes."""
    p = k // 2
    N = num_images * H * W
    n = np.arange(N)
    y = (n // W) % H
    x = n % W
    masks = np.zeros((k * k, N), np.float32)
    for s in range(k * k):
        dy, dx = divmod(s, k)
        oy, ox = dy - p, dx - p
        valid = (y + oy >= 0) & (y + oy < H) & (x + ox >= 0) & (x + ox < W)
        masks[s] = valid.astype(np.float32)
    return masks


# ----------------------------------------------------------------------------
# Weight packing: masked OIHW gate weights -> gate-packed im2col matrices
# ----------------------------------------------------------------------------
def pack_conv_weight(w_oihw):
    """OIHW [Cout, Cin, k, k] -> [Cout, k*k*Cin]; column = (dy*k + dx)*Cin + ci
    (matches the tap-major / channel-minor row order of the im2col patches)."""
    co, ci, kh, kw = w_oihw.shape
    return jnp.transpose(w_oihw, (0, 2, 3, 1)).reshape(co, kh * kw * ci)


def pack_fused_params(layers, hidden_size):
    """Pack all layers for the fused kernel.

    Layer 1: x-half of all three gates packed along Cout ([3C, k*k*cin_pad],
    for the hoisted all-T matmul) plus h-half update/reset ([2C, k*k*C]) and
    h-half out gate ([C, k*k*C]).
    Layers >= 2: per gate, x-half (previous layer's h) and h-half fused along
    K into one matrix ([2C, k*k*2C] for update/reset, [C, k*k*2C] for out).
    Everything is pre-cast to MATMUL_DTYPE (biases stay f32: they are added to
    the f32 accumulators)."""
    C = hidden_size
    sub = _sublane(MATMUL_DTYPE)
    assert C % sub == 0, "hidden_size must be a multiple of the sublane tile"
    cast = lambda a: a.astype(MATMUL_DTYPE)

    l0 = layers[0]
    in_dim = l0["in_dim"]
    cin_pad = ((in_dim + sub - 1) // sub) * sub

    def split_pad(w):  # layer-1 gate weight -> (packed x-half, packed h-half)
        wx, wh = w[:, :in_dim], w[:, in_dim:]
        if cin_pad != in_dim:
            wx = jnp.pad(wx, ((0, 0), (0, cin_pad - in_dim), (0, 0), (0, 0)))
        return pack_conv_weight(wx), pack_conv_weight(wh)

    wux, wuh = split_pad(l0["Wu"])
    wrx, wrh = split_pad(l0["Wr"])
    wox, woh = split_pad(l0["Wo"])
    packed = {
        "wx1": cast(jnp.concatenate([wux, wrx, wox], axis=0)),   # [3C, kk*cin_pad]
        "wh_ur1": cast(jnp.concatenate([wuh, wrh], axis=0)),     # [2C, kk*C]
        "wh_o1": cast(woh),                                      # [ C, kk*C]
        "b1": jnp.concatenate([l0["bu"], l0["br"], l0["bo"]]
                              ).reshape(3 * C, 1).astype(jnp.float32),
        "extra": [],
    }

    for layer in layers[1:]:
        assert layer["in_dim"] == C

        def fuse(w):  # [C, kk*2C]: x-half (prev layer h) columns, then own-h
            return jnp.concatenate(
                [pack_conv_weight(w[:, :C]), pack_conv_weight(w[:, C:])], axis=1)

        packed["extra"].append({
            "w_ur": cast(jnp.concatenate([fuse(layer["Wu"]),
                                          fuse(layer["Wr"])], axis=0)),
            "w_o": cast(fuse(layer["Wo"])),
            "b": jnp.concatenate([layer["bu"], layer["br"], layer["bo"]]
                                 ).reshape(3 * C, 1).astype(jnp.float32),
        })
    return packed


# ----------------------------------------------------------------------------
# Fused kernel: hoisted layer-1 x-path + all layers, all timesteps, in one call
# ----------------------------------------------------------------------------
def make_fused_kernel(num_layers, chid, cin_pad, k, img_w, n_lanes, seq_len,
                      roll_to_higher):
    p = k // 2
    kk = k * k

    def shifted(v, d):
        # shifted(v, d)[:, n] == v[:, (n + d) % size]; out-of-image taps are
        # zeroed by the validity mask applied by the caller, so wrap-around
        # across image/timestep boundaries never leaks into the result.
        if d == 0:
            return v
        size = v.shape[-1]
        shift = (-d) % size if roll_to_higher else d % size
        return pltpu.roll(v, shift, 1)

    def im2col(v, masks):
        # v: [c, n] (c multiple of the sublane tile, n multiple of 128)
        parts = []
        for s in range(kk):
            dy, dx = divmod(s, k)
            d = (dy - p) * img_w + (dx - p)
            parts.append(shifted(v, d) * masks[s:s + 1, :])
        # direct sublane-axis concat of tile-aligned slabs (no stack+reshape
        # relayout copy)
        return jnp.concatenate(parts, axis=0)            # [kk*c, n]

    def mm(a, b):
        return jnp.dot(a, b, preferred_element_type=jnp.float32)

    def kernel(*refs):
        (x_ref, maskf_ref, wx1_ref, whur1_ref, who1_ref, b1_ref) = refs[:6]
        extra_refs = [refs[6 + 3 * i: 9 + 3 * i] for i in range(num_layers - 1)]
        y_ref = refs[6 + 3 * (num_layers - 1)]
        gx_ref = refs[7 + 3 * (num_layers - 1)]

        masks_full = maskf_ref[...]                      # [kk, T*NL]
        masks = masks_full[:, 0:n_lanes]                 # pattern repeats every H*W

        # ---- hoisted layer-1 x-path: ONE matmul over all T timesteps --------
        # (off the serial per-step chain; MXU sees T*NL lanes instead of NL)
        xpat = im2col(x_ref[0].astype(MATMUL_DTYPE), masks_full)  # [kk*cin_pad, T*NL]
        g_all = mm(wx1_ref[...], xpat)                   # [3C, T*NL] f32
        b1 = b1_ref[...]                                 # [3C, 1]
        for t in range(seq_len):
            gx_ref[t] = g_all[:, t * n_lanes:(t + 1) * n_lanes] + b1

        # ---- recurrent part: all layers fused, T statically unrolled --------
        # (for long sequences swap this for lax.fori_loop reading gx_ref[t])
        hs = [jnp.zeros((chid, n_lanes), jnp.float32) for _ in range(num_layers)]
        # cached im2col patches of each layer's current hidden state; reused as
        # the next layer's x-patches (same t) and the same layer's h-patches
        # (t+1).  im2col(0) == 0, so zero init is exact.
        h_pats = [jnp.zeros((kk * chid, n_lanes), MATMUL_DTYPE)
                  for _ in range(num_layers)]

        for t in range(seq_len):
            for l in range(num_layers):
                h = hs[l]
                h_pat = h_pats[l]
                if l == 0:
                    gx = gx_ref[t]                       # [3C, NL], bias folded in
                    g_ur = gx[0:2 * chid] + mm(whur1_ref[...], h_pat)
                    u = jax.nn.sigmoid(g_ur[0:chid])
                    r = jax.nn.sigmoid(g_ur[chid:2 * chid])
                    hr_pat = im2col((h * r).astype(MATMUL_DTYPE), masks)
                    o = jnp.tanh(gx[2 * chid:3 * chid]
                                 + mm(who1_ref[...], hr_pat))
                else:
                    wur_ref, wo_ref, b_ref = extra_refs[l - 1]
                    b = b_ref[...]
                    # x-patches of this layer == patches of the PREVIOUS
                    # layer's freshly updated hidden state (already cached).
                    prev_pat = h_pats[l - 1]
                    g_ur = mm(wur_ref[...],
                              jnp.concatenate([prev_pat, h_pat], axis=0)
                              ) + b[0:2 * chid]
                    u = jax.nn.sigmoid(g_ur[0:chid])
                    r = jax.nn.sigmoid(g_ur[chid:2 * chid])
                    hr_pat = im2col((h * r).astype(MATMUL_DTYPE), masks)
                    o = jnp.tanh(mm(wo_ref[...],
                                    jnp.concatenate([prev_pat, hr_pat], axis=0))
                                 + b[2 * chid:3 * chid])
                h_new = h * (1.0 - u) + o * u
                hs[l] = h_new
                # only (re)compute the patch cache if somebody will read it
                if (l < num_layers - 1) or (t < seq_len - 1):
                    h_pats[l] = im2col(h_new.astype(MATMUL_DTYPE), masks)
                # dropout (p=0.1) is eval-mode identity here
            y_ref[0, t] = hs[-1]                         # last layer only

    return kernel


def convgru_forward_pallas(x, params, hidden_size, kernel_size, batch_tile=1):
    """x: [B, T, C, H, W] (PyTorch layout). Returns [B, T, hidden, H, W]
    (the last layer's output sequence, exactly what ConvGRUMask.forward returns)."""
    B, T, C, H, W = x.shape
    k = kernel_size
    chid = hidden_size
    num_layers = 1 + len(params["extra"])
    cin_pad = params["wx1"].shape[1] // (k * k)

    # the roll-based im2col is only valid for whole images per block
    assert B % batch_tile == 0, "batch tiles must contain whole images"
    n_btiles = B // batch_tile
    NL = batch_tile * H * W                  # per-timestep lanes
    NT = T * NL                              # full-sequence lanes (hoist)
    assert NL % 128 == 0, "per-step flattened size must be a multiple of 128"

    masks_full = jnp.asarray(make_shift_masks(T * batch_tile, H, W, k),
                             MATMUL_DTYPE)                       # [kk, NT]

    # one-time relayout: [B,T,C,H,W] -> [n_btiles, cin_pad, T*NL],
    # lane order (t, b_within_tile, y, x)
    x_t = x.reshape(n_btiles, batch_tile, T, C, H, W)
    x_t = jnp.transpose(x_t, (0, 3, 2, 1, 4, 5)).reshape(n_btiles, C, NT)
    if cin_pad != C:
        x_t = jnp.pad(x_t, ((0, 0), (0, cin_pad - C), (0, 0)))

    kernel = make_fused_kernel(num_layers, chid, cin_pad, k, W, NL, T,
                               _roll_convention())

    def resident(shape):
        nd = len(shape)
        # invariant inputs: constant block index -> never re-DMA'd.  At large
        # sizes also mark pipeline_mode=pl.Buffered(1) (v7x 64 MiB VMEM).
        return pl.BlockSpec(shape, lambda b, nd=nd: (0,) * nd)

    in_specs = [
        pl.BlockSpec((1, cin_pad, NT), lambda b: (b, 0, 0)),     # per-tile x
        resident(masks_full.shape),
        resident(params["wx1"].shape),
        resident(params["wh_ur1"].shape),
        resident(params["wh_o1"].shape),
        resident(params["b1"].shape),
    ]
    inputs = [x_t, masks_full, params["wx1"], params["wh_ur1"],
              params["wh_o1"], params["b1"]]
    for lp in params["extra"]:
        in_specs += [resident(lp["w_ur"].shape), resident(lp["w_o"].shape),
                     resident(lp["b"].shape)]
        inputs += [lp["w_ur"], lp["w_o"], lp["b"]]

    grid_spec = pltpu.PrefetchScalarGridSpec(
        num_scalar_prefetch=0,
        grid=(n_btiles,),
        in_specs=in_specs,
        out_specs=pl.BlockSpec((1, T, chid, NL), lambda b: (b, 0, 0, 0)),
        scratch_shapes=[pltpu.VMEM((T, 3 * chid, NL), jnp.float32)],
    )
    y = pl.pallas_call(
        kernel,
        grid_spec=grid_spec,
        out_shape=jax.ShapeDtypeStruct((n_btiles, T, chid, NL), jnp.float32),
        compiler_params=pltpu.CompilerParams(
            dimension_semantics=("parallel",)),   # v7x: 2 TCs split batch tiles
    )(*inputs)

    # relayout back to the PyTorch [B, T, hidden, H, W] layout
    y = y.reshape(n_btiles, T, chid, batch_tile, H, W)
    y = jnp.transpose(y, (0, 3, 1, 2, 4, 5)).reshape(B, T, chid, H, W)
    return y


# ----------------------------------------------------------------------------
# Parameter setup (deterministic) and pure-JAX reference for verification
# ----------------------------------------------------------------------------
def init_params(key, input_size, hidden_size, kernel_size, gsh, gsw, num_layers):
    np_rng = np.random.default_rng(0)
    layers = []
    for i in range(num_layers):
        in_dim = input_size if i == 0 else hidden_size
        cin_tot = in_dim + hidden_size
        key, ku, kr, ko = jax.random.split(key, 4)
        layer = {"in_dim": in_dim}
        for name, kk_ in (("u", ku), ("r", kr), ("o", ko)):
            w = jax.random.normal(
                kk_, (hidden_size, cin_tot, kernel_size, kernel_size),
                jnp.float32) * 0.1
            mask = make_gaussian_kernel_mask_vary_channel(
                gsh, gsw, kernel_size, hidden_size, cin_tot, np_rng)
            layer["W" + name] = w * jnp.asarray(mask, jnp.float32)  # masked OIHW
            layer["b" + name] = jnp.zeros((hidden_size,), jnp.float32)
        layers.append(layer)
    return layers


def conv_nchw(x, w, b, pad):
    y = lax.conv_general_dilated(
        x, w, window_strides=(1, 1), padding=[(pad, pad), (pad, pad)],
        dimension_numbers=("NCHW", "OIHW", "NCHW"),
        precision=lax.Precision.HIGHEST)
    return y + b[None, :, None, None]


def convgru_forward_ref(x, layers, hidden_size, kernel_size):
    B, T, C, H, W = x.shape
    pad = kernel_size // 2
    cur = x
    for layer in layers:
        h = jnp.zeros((B, hidden_size, H, W), jnp.float32)
        outs = []
        for t in range(T):
            xt = cur[:, t]
            comb = jnp.concatenate([xt, h], axis=1)
            upd = jax.nn.sigmoid(conv_nchw(comb, layer["Wu"], layer["bu"], pad))
            rst = jax.nn.sigmoid(conv_nchw(comb, layer["Wr"], layer["br"], pad))
            comb2 = jnp.concatenate([xt, h * rst], axis=1)
            out = jnp.tanh(conv_nchw(comb2, layer["Wo"], layer["bo"], pad))
            h = h * (1.0 - upd) + out * upd
            outs.append(h)
        cur = jnp.stack(outs, axis=1)
    return cur


# ----------------------------------------------------------------------------
if __name__ == "__main__":
    B, T, C, H, W = 2, 8, 4, 16, 16        # per-step lanes = batch_tile*H*W
    hidden_size = 16
    kernel_size = 3
    gsh, gsw = 0.8, 1.0                    # gsw * EDGE_Z = 1 -> 3x3 mask == kernel
    num_layers = 2
    batch_tile = 1                         # 2 tiles -> both v7x TCs busy

    key = jax.random.PRNGKey(0)
    kx, kp = jax.random.split(key)
    x = jax.random.normal(kx, (B, T, C, H, W), jnp.float32)

    layers = init_params(kp, C, hidden_size, kernel_size, gsh, gsw, num_layers)
    packed = pack_fused_params(layers, hidden_size)

    _roll_convention()                     # run the one-time probe up front

    forward = jax.jit(convgru_forward_pallas, static_argnums=(2, 3, 4))
    y_pallas = jax.block_until_ready(
        forward(x, packed, hidden_size, kernel_size, batch_tile))

    y_ref = jax.block_until_ready(
        convgru_forward_ref(x, layers, hidden_size, kernel_size))

    assert y_pallas.shape == (B, T, hidden_size, H, W), y_pallas.shape
    # tolerance leaves room for the MXU's default f32 matmul precision
    np.testing.assert_allclose(np.asarray(y_pallas), np.asarray(y_ref),
                               rtol=1e-2, atol=1e-2)
    print("KERNEL_OK")
</pallas_src>

<mosaic_0001>
module attributes {stable_mosaic.version = 11 : i64} {
  func.func @probe(%arg0: memref<8x128xf32, #tpu.memory_space<vmem>>, %arg1: memref<8x128xf32, #tpu.memory_space<vmem>>) attributes {dimension_semantics = [], scalar_prefetch = 0 : i64, scratch_operands = 0 : i64, tpu.core_type = #tpu.core_type<tc>} {
    %c0 = arith.constant 0 : index
    %c0_0 = arith.constant 0 : index
    %0 = vector.load %arg0[%c0, %c0_0] : memref<8x128xf32, #tpu.memory_space<vmem>>, vector<8x128xf32>
    %c1_i32 = arith.constant 1 : i32
    %1 = tpu.dynamic_rotate %0 by %c1_i32 dim 1 : vector<8x128xf32>, i32 -> vector<8x128xf32>
    %c0_1 = arith.constant 0 : index
    %c0_2 = arith.constant 0 : index
    %2 = vector.load %arg1[%c0_1, %c0_2] : memref<8x128xf32, #tpu.memory_space<vmem>>, vector<8x128xf32>
    tpu.vector_store %arg1[%c0_1, %c0_2], %1 {strides = array<i32>} : memref<8x128xf32, #tpu.memory_space<vmem>>, vector<8x128xf32>,
    return
  }
}

</mosaic_0001>

<bundles_post_ra>
// kernel: tpu_custom_call.1
= control target key start
LH: loop header
LB: loop body
LE: loop exit
PB: predicated region body
PF: predicated region fallthrough
CT: control target
= control target key end

     0   :  { %6 = vsyncpa [#allocation3], 0  ;;  %s128_s0 = inlined_call_operand.hbm [shape: f32[8,128], index: 0, kind: input, shape index: {}]   ;;  %s129_s1 = inlined_call_operand.hbm [shape: f32[8,128], index: 1, kind: output, shape index: {}]  }
   0x1   :  { %7 = vsyncpa [#allocation4], 0  ;;  %s91_s6 = smov [#allocation2]   ;;  %s43_s10 = scalar_lea.hbm %s128_s0, 128 }
   0x2   :  { %s14_s7 = sshll.u32 %s91_s6, 4  ;;  %p44_p0 = scmp.ne.s32.totalorder %s128_s0, %s43_s10  ;;  %s15_s7 = int_to_ptr.vmem [resolvable:$true] %s14_s7 }
   0x3   :  { %p47_p1 = scmp.lt.u32.totalorder %s43_s10, %s128_s0 }
   0x5   :  { %p49_p2 = pnand %p47_p1, %p44_p0 }
   0x7   :  { %52 = shalt.err (!%p49_p2)
}
   0x8   :  { %s53_s15 = scalar_lea.vmem %s15_s7, 128  ;;  %p58_p4 = scmp.lt.s32.totalorder %s15_s7, %s15_s7 }
   0x9   :  { %p54_p3 = scmp.ne.s32.totalorder %s15_s7, %s53_s15  ;;  %p59_p5 = scmp.lt.s32.totalorder %s53_s15, %s53_s15 }
   0xb   :  { %p60_p6 = por %p59_p5, %p58_p4 }
   0xd   :  { %p61_p7 = pnand %p60_p6, %p54_p3 }
   0xf   :  { %64 = shalt.err (!%p61_p7)
}
  0x10   :  { %17 = dma.hbm_to_vmem [thread:$0]  %s128_s0, 128, %s15_s7, [#allocation3]  }
  0x11   :  { %87 = dma.done.wait [#allocation3], 128  }
  0x12   :  { %88 = vsyncadd [#allocation3], 4294967168  ;;  %v21_v0 = vld [vmem:[#allocation2] sm:$0xff]  ;;  %s92_s18 = smov 1   ;;  %s93_s19 = smov [#allocation5]  }
  0x13   :  { %22 = vrot.lane.b32.xlu0 %v21_v0, %s92_s18  ;;  %s31_s20 = sshll.u32 %s93_s19, 4  ;;  %s32_s20 = int_to_ptr.vmem [resolvable:$true] %s31_s20 }
  0x14   :  { %s65_s21 = scalar_lea.vmem %s32_s20, 128  ;;  %p70_p9 = scmp.lt.s32.totalorder %s32_s20, %s32_s20 }
  0x15   :  { %p66_p8 = scmp.ne.s32.totalorder %s32_s20, %s65_s21  ;;  %p71_p10 = scmp.lt.s32.totalorder %s65_s21, %s65_s21 }
  0x17   :  { %p72_p11 = por %p71_p10, %p70_p9 }
  0x19   :  { %p73_p12 = pnand %p72_p11, %p66_p8 }
  0x85   :  { %v23_v1 = vpop.permute.xlu0 %22 }
  0x86   :  { %24 = vst [vmem:[#allocation5] sm:$0xff] %v23_v1 }
  0x87   :  { %76 = shalt.err (!%p73_p12)
}
  0x88   :  { %s77_s0 = scalar_lea.hbm %s129_s1, 128 }
  0x89   :  { %p78_p13 = scmp.ne.s32.totalorder %s129_s1, %s77_s0  ;;  %p81_p0 = scmp.lt.u32.totalorder %s77_s0, %s129_s1 }
  0x8b   :  { %p83_p1 = pnand %p81_p0, %p78_p13 }
  0x8d   :  { %86 = shalt.err (!%p83_p1)
}
  0x8e   :  { %34 = dma.vmem_to_hbm [thread:$0]  %s32_s20, 128, %s129_s1, [#allocation4]  }
  0x8f   :  { %89 = dma.done.wait [#allocation4], 128  }
  0x90   :  { %90 = vsyncadd [#allocation4], 4294967168 }
  0x91   :  { %38 = vsyncpa [#allocation3], 1 }
  0x92   :  { %39 = vsyncpa [#allocation4], 1 }

</bundles_post_ra>
